<compile_context>
chip_gen: v6e
topology: v6e:2x2x1
jax: 0.10.0
libtpu: 0.0.40
codegen_flags: <defaults>
</compile_context>

<pallas_src>
import jax
import jax.numpy as jnp
from jax import lax
from jax.experimental import pallas as pl
from jax.experimental.pallas import tpu as pltpu

_BN_EPS = 1e-5


# --------------------------------------------------------------------------
# Kernel: 4 x (reflect-pad conv1d(k=3) as one fused matmul + folded BN) with
# the ResBlock residual add, all for one batch element per grid step.
# --------------------------------------------------------------------------
def _block_kernel(x_ref,
                  w0, t0,    # Block.bc        (conv+BN folded)
                  w1, t1,    # ResBlock.bc1
                  w2, t2,    # ResBlock.bc2
                  w3, t3, s3,  # ResBlock.conv1 + bn1 (s3 kept for residual)
                  res_ref):
    x = x_ref[...].astype(jnp.float32)            # (Cin, L)

    def shift_cat(a):
        # a: (C, L) f32 -> (3C, L): [a[l-1]; a[l]; a[l+1]] with PyTorch
        # 'reflect' padding (left pad = a[:,1], right pad = a[:,L-2]).
        L = a.shape[1]
        left = jnp.concatenate([a[:, 1:2], a[:, :L - 1]], axis=1)
        right = jnp.concatenate([a[:, 1:], a[:, L - 2:L - 1]], axis=1)
        return jnp.concatenate([left, a, right], axis=0)

    def conv(a, w_ref):
        # Single fused-tap matmul: bf16 operands, f32 accumulation.
        xc = shift_cat(a).astype(jnp.bfloat16)    # (3C, L)
        return jnp.dot(w_ref[...], xc, preferred_element_type=jnp.float32)

    # Block.bc : conv -> BN -> ReLU   (bias+BN folded into w/t)
    h = jnp.maximum(conv(x, w0) + t0[...], 0.0)
    # ResBlock: bc1 -> bc2 -> conv1 -> +residual -> bn1 -> ReLU
    h1 = jnp.maximum(conv(h, w1) + t1[...], 0.0)
    h2 = jnp.maximum(conv(h1, w2) + t2[...], 0.0)
    # relu(((conv(h2)+b3) + h) * s3 + t3) == relu(w3'@x + t3' + h*s3)
    y = jnp.maximum(conv(h2, w3) + t3[...] + h * s3[...], 0.0)

    res_ref[...] = y.astype(res_ref.dtype)


# --------------------------------------------------------------------------
# Wrapper
# --------------------------------------------------------------------------
def block_forward(x, packed):
    """x: (B, Cin, L) f32. packed: list of 4 stage dicts {'w','t','s'}."""
    B, Cin, L = x.shape
    Cout = packed[0]['w'].shape[0]
    assert L >= 2 and L % 2 == 0, "MaxPool1d(2) path assumes even L >= 2"

    flat = []
    in_specs = [pl.BlockSpec((None, Cin, L), lambda b: (b, 0, 0))]
    for p in packed:
        flat.append(p['w'])
        in_specs.append(pl.BlockSpec(p['w'].shape, lambda b: (0, 0)))
        flat.append(p['t'])
        in_specs.append(pl.BlockSpec(p['t'].shape, lambda b: (0, 0)))
    flat.append(packed[3]['s'])
    in_specs.append(pl.BlockSpec(packed[3]['s'].shape, lambda b: (0, 0)))

    res = pl.pallas_call(
        _block_kernel,
        out_shape=jax.ShapeDtypeStruct((B, Cout, L), jnp.float32),
        grid_spec=pltpu.PrefetchScalarGridSpec(
            num_scalar_prefetch=0,
            grid=(B,),
            in_specs=in_specs,
            out_specs=pl.BlockSpec((None, Cout, L), lambda b: (b, 0, 0))),
        compiler_params=pltpu.CompilerParams(
            dimension_semantics=("parallel",)),
    )(x, *flat)

    # Sampler = MaxPool1d(kernel=2, stride=2): O(L) reshape+max done by XLA on
    # the residual output (stride-2 lane compaction kept out of the kernel).
    samp = jnp.max(res.reshape(B, Cout, L // 2, 2), axis=-1)
    return {'residual': res, 'sampled': samp}


# --------------------------------------------------------------------------
# Parameter init (PyTorch-style) and host-side packing / folding
# --------------------------------------------------------------------------
def _init_stage(key, ci, co):
    kw, kb, kg, kbt, km, kv = jax.random.split(key, 6)
    bound = 1.0 / (ci * 3) ** 0.5
    return {'w': jax.random.uniform(kw, (co, ci, 3), jnp.float32, -bound, bound),
            'b': jax.random.uniform(kb, (co,), jnp.float32, -bound, bound),
            'gamma': jax.random.uniform(kg, (co,), jnp.float32, 0.5, 1.5),
            'beta': jax.random.uniform(kbt, (co,), jnp.float32, -0.5, 0.5),
            'mean': jax.random.uniform(km, (co,), jnp.float32, -0.5, 0.5),
            'var': jax.random.uniform(kv, (co,), jnp.float32, 0.5, 1.5)}


def pack_params(raw):
    """Fold conv bias + BN into the weights, concat the 3 taps, cast to bf16."""
    packed = []
    for p in raw:
        s = p['gamma'] / jnp.sqrt(p['var'] + _BN_EPS)            # (Co,)
        t = p['beta'] - p['mean'] * s + p['b'] * s               # b*s + BN shift
        w_eff = p['w'] * s[:, None, None]                        # (Co, Ci, 3)
        w_cat = jnp.concatenate(
            [w_eff[:, :, 0], w_eff[:, :, 1], w_eff[:, :, 2]], axis=1)  # (Co, 3Ci)
        packed.append({'w': w_cat.astype(jnp.bfloat16),
                       't': t[:, None].astype(jnp.float32),
                       's': s[:, None].astype(jnp.float32)})
    return packed


# --------------------------------------------------------------------------
# References for numerical verification
# --------------------------------------------------------------------------
def ref_forward_packed(x, packed):
    """Mirrors the kernel math (same packed params / precision), no Pallas."""
    def shift_cat(a):                                   # a: (B, C, L)
        L = a.shape[-1]
        left = jnp.concatenate([a[..., 1:2], a[..., :L - 1]], axis=-1)
        right = jnp.concatenate([a[..., 1:], a[..., L - 2:L - 1]], axis=-1)
        return jnp.concatenate([left, a, right], axis=1)

    def conv(a, w):
        xc = shift_cat(a).astype(jnp.bfloat16)
        return jnp.einsum('oc,bcl->bol', w, xc,
                          preferred_element_type=jnp.float32)

    p0, p1, p2, p3 = packed
    h = jax.nn.relu(conv(x, p0['w']) + p0['t'][None])
    h1 = jax.nn.relu(conv(h, p1['w']) + p1['t'][None])
    h2 = jax.nn.relu(conv(h1, p2['w']) + p2['t'][None])
    y = jax.nn.relu(conv(h2, p3['w']) + p3['t'][None] + h * p3['s'][None])
    B, C, L = y.shape
    return {'residual': y,
            'sampled': jnp.max(y.reshape(B, C, L // 2, 2), axis=-1)}


def ref_forward_torchlike(x, raw):
    """Faithful f32 PyTorch-style reference (unfolded conv+bias, BN, relu)."""
    def conv(a, p):
        ap = jnp.pad(a, ((0, 0), (0, 0), (1, 1)), mode='reflect')
        out = lax.conv_general_dilated(ap, p['w'], (1,), 'VALID',
                                       dimension_numbers=('NCH', 'OIH', 'NCH'),
                                       precision=lax.Precision.HIGHEST)
        return out + p['b'][None, :, None]

    def bn(a, p):
        s = p['gamma'] / jnp.sqrt(p['var'] + _BN_EPS)
        t = p['beta'] - p['mean'] * s
        return a * s[None, :, None] + t[None, :, None]

    def cbr(a, p):
        return jax.nn.relu(bn(conv(a, p), p))

    h = cbr(x, raw[0])
    h1 = cbr(h, raw[1])
    h2 = cbr(h1, raw[2])
    z = conv(h2, raw[3]) + h
    y = jax.nn.relu(bn(z, raw[3]))
    B, C, L = y.shape
    return {'residual': y,
            'sampled': jnp.max(y.reshape(B, C, L // 2, 2), axis=-1)}


if __name__ == "__main__":
    key = jax.random.PRNGKey(0)
    kx, k0, k1, k2, k3 = jax.random.split(key, 5)
    # Small shapes; L chosen so L and L//2 are lane-dense (multiples of 128).
    B, Cin, Cout, L = 2, 4, 8, 256
    x = jax.random.normal(kx, (B, Cin, L), jnp.float32)
    raw = [_init_stage(k0, Cin, Cout),    # Block.bc
           _init_stage(k1, Cout, Cout),   # ResBlock.bc1
           _init_stage(k2, Cout, Cout),   # ResBlock.bc2
           _init_stage(k3, Cout, Cout)]   # ResBlock.conv1 + bn1
    packed = pack_params(raw)

    out = block_forward(x, packed)
    jax.block_until_ready(out)

    assert out['residual'].shape == (B, Cout, L)
    assert out['sampled'].shape == (B, Cout, L // 2)

    # Tight check vs. a reference that mirrors the kernel's precision choices.
    ref = ref_forward_packed(x, packed)
    assert jnp.allclose(out['residual'], ref['residual'], atol=2e-2, rtol=2e-2)
    assert jnp.allclose(out['sampled'], ref['sampled'], atol=2e-2, rtol=2e-2)

    # Looser check vs. the faithful f32 PyTorch-style forward (validates the
    # BN/bias folding and reflect/residual/pool semantics; slack covers bf16
    # matmul operands).
    tref = ref_forward_torchlike(x, raw)
    assert jnp.allclose(out['residual'], tref['residual'], atol=5e-2, rtol=5e-2)
    assert jnp.allclose(out['sampled'], tref['sampled'], atol=5e-2, rtol=5e-2)

    print("KERNEL_OK")
</pallas_src>

<mosaic_0001>
module attributes {stable_mosaic.version = 11 : i64} {
  func.func @_block_kernel(%arg0: i32, %arg1: memref<1x4x256xf32, #tpu.memory_space<vmem>>, %arg2: memref<8x12xbf16, #tpu.memory_space<vmem>>, %arg3: memref<8x1xf32, #tpu.memory_space<vmem>>, %arg4: memref<8x24xbf16, #tpu.memory_space<vmem>>, %arg5: memref<8x1xf32, #tpu.memory_space<vmem>>, %arg6: memref<8x24xbf16, #tpu.memory_space<vmem>>, %arg7: memref<8x1xf32, #tpu.memory_space<vmem>>, %arg8: memref<8x24xbf16, #tpu.memory_space<vmem>>, %arg9: memref<8x1xf32, #tpu.memory_space<vmem>>, %arg10: memref<8x1xf32, #tpu.memory_space<vmem>>, %arg11: memref<1x8x256xf32, #tpu.memory_space<vmem>>) attributes {dimension_semantics = [#tpu.dimension_semantics<parallel>], iteration_bounds = array<i64: 2>, scalar_prefetch = 0 : i64, scratch_operands = 0 : i64, tpu.core_type = #tpu.core_type<tc>, window_params = [{transform_indices = @transform_0, window_bounds = array<i64: 1, 4, 256>}, {pipeline_mode = #tpu.pipeline_mode<synchronous>, transform_indices = @transform_1, window_bounds = array<i64: 8, 12>}, {pipeline_mode = #tpu.pipeline_mode<synchronous>, transform_indices = @transform_2, window_bounds = array<i64: 8, 1>}, {pipeline_mode = #tpu.pipeline_mode<synchronous>, transform_indices = @transform_3, window_bounds = array<i64: 8, 24>}, {pipeline_mode = #tpu.pipeline_mode<synchronous>, transform_indices = @transform_4, window_bounds = array<i64: 8, 1>}, {pipeline_mode = #tpu.pipeline_mode<synchronous>, transform_indices = @transform_5, window_bounds = array<i64: 8, 24>}, {pipeline_mode = #tpu.pipeline_mode<synchronous>, transform_indices = @transform_6, window_bounds = array<i64: 8, 1>}, {pipeline_mode = #tpu.pipeline_mode<synchronous>, transform_indices = @transform_7, window_bounds = array<i64: 8, 24>}, {pipeline_mode = #tpu.pipeline_mode<synchronous>, transform_indices = @transform_8, window_bounds = array<i64: 8, 1>}, {pipeline_mode = #tpu.pipeline_mode<synchronous>, transform_indices = @transform_9, window_bounds = array<i64: 8, 1>}, {transform_indices = @transform_10, window_bounds = array<i64: 1, 8, 256>}]} {
    %c0 = arith.constant 0 : index
    %c0_0 = arith.constant 0 : index
    %c0_1 = arith.constant 0 : index
    %0 = vector.load %arg1[%c0, %c0_0, %c0_1] : memref<1x4x256xf32, #tpu.memory_space<vmem>>, vector<1x4x256xf32>
    %1 = vector.shape_cast %0 : vector<1x4x256xf32> to vector<4x256xf32>
    %2 = vector.extract_strided_slice %1 {offsets = [0, 1], sizes = [4, 1], strides = [1, 1]} : vector<4x256xf32> to vector<4x1xf32>
    %3 = vector.extract_strided_slice %1 {offsets = [0, 0], sizes = [4, 255], strides = [1, 1]} : vector<4x256xf32> to vector<4x255xf32>
    %4 = tpu.concatenate %2, %3 in 1 : vector<4x1xf32>, vector<4x255xf32> -> vector<4x256xf32>
    %5 = vector.extract_strided_slice %1 {offsets = [0, 1], sizes = [4, 255], strides = [1, 1]} : vector<4x256xf32> to vector<4x255xf32>
    %6 = vector.extract_strided_slice %1 {offsets = [0, 254], sizes = [4, 1], strides = [1, 1]} : vector<4x256xf32> to vector<4x1xf32>
    %7 = tpu.concatenate %5, %6 in 1 : vector<4x255xf32>, vector<4x1xf32> -> vector<4x256xf32>
    %8 = tpu.concatenate %4, %1, %7 in 0 : vector<4x256xf32>, vector<4x256xf32>, vector<4x256xf32> -> vector<12x256xf32>
    %9 = arith.truncf %8 : vector<12x256xf32> to vector<12x256xbf16>
    %c0_2 = arith.constant 0 : index
    %c0_3 = arith.constant 0 : index
    %10 = vector.load %arg2[%c0_2, %c0_3] : memref<8x12xbf16, #tpu.memory_space<vmem>>, vector<8x12xbf16>
    %cst = arith.constant dense<0.000000e+00> : vector<8x256xf32>
    %11 = tpu.matmul %10, %9, %cst {dimension_numbers = #tpu.dot_dimension_numbers<[1], [0], [0], [1], [0, 0, 1, 1], [], []>} : vector<8x12xbf16>, vector<12x256xbf16>, vector<8x256xf32> -> vector<8x256xf32>
    %c0_4 = arith.constant 0 : index
    %c0_5 = arith.constant 0 : index
    %12 = vector.load %arg3[%c0_4, %c0_5] : memref<8x1xf32, #tpu.memory_space<vmem>>, vector<8x1xf32>
    %13 = vector.broadcast %12 : vector<8x1xf32> to vector<8x256xf32>
    %14 = arith.addf %11, %13 : vector<8x256xf32>
    %cst_6 = arith.constant 0.000000e+00 : f32
    %15 = vector.broadcast %cst_6 : f32 to vector<8x256xf32>
    %16 = arith.maximumf %14, %15 : vector<8x256xf32>
    %17 = vector.extract_strided_slice %16 {offsets = [0, 1], sizes = [8, 1], strides = [1, 1]} : vector<8x256xf32> to vector<8x1xf32>
    %18 = vector.extract_strided_slice %16 {offsets = [0, 0], sizes = [8, 255], strides = [1, 1]} : vector<8x256xf32> to vector<8x255xf32>
    %19 = tpu.concatenate %17, %18 in 1 : vector<8x1xf32>, vector<8x255xf32> -> vector<8x256xf32>
    %20 = vector.extract_strided_slice %16 {offsets = [0, 1], sizes = [8, 255], strides = [1, 1]} : vector<8x256xf32> to vector<8x255xf32>
    %21 = vector.extract_strided_slice %16 {offsets = [0, 254], sizes = [8, 1], strides = [1, 1]} : vector<8x256xf32> to vector<8x1xf32>
    %22 = tpu.concatenate %20, %21 in 1 : vector<8x255xf32>, vector<8x1xf32> -> vector<8x256xf32>
    %23 = tpu.concatenate %19, %16, %22 in 0 : vector<8x256xf32>, vector<8x256xf32>, vector<8x256xf32> -> vector<24x256xf32>
    %24 = arith.truncf %23 : vector<24x256xf32> to vector<24x256xbf16>
    %c0_7 = arith.constant 0 : index
    %c0_8 = arith.constant 0 : index
    %25 = vector.load %arg4[%c0_7, %c0_8] : memref<8x24xbf16, #tpu.memory_space<vmem>>, vector<8x24xbf16>
    %cst_9 = arith.constant dense<0.000000e+00> : vector<8x256xf32>
    %26 = tpu.matmul %25, %24, %cst_9 {dimension_numbers = #tpu.dot_dimension_numbers<[1], [0], [0], [1], [0, 0, 1, 1], [], []>} : vector<8x24xbf16>, vector<24x256xbf16>, vector<8x256xf32> -> vector<8x256xf32>
    %c0_10 = arith.constant 0 : index
    %c0_11 = arith.constant 0 : index
    %27 = vector.load %arg5[%c0_10, %c0_11] : memref<8x1xf32, #tpu.memory_space<vmem>>, vector<8x1xf32>
    %28 = vector.broadcast %27 : vector<8x1xf32> to vector<8x256xf32>
    %29 = arith.addf %26, %28 : vector<8x256xf32>
    %cst_12 = arith.constant 0.000000e+00 : f32
    %30 = vector.broadcast %cst_12 : f32 to vector<8x256xf32>
    %31 = arith.maximumf %29, %30 : vector<8x256xf32>
    %32 = vector.extract_strided_slice %31 {offsets = [0, 1], sizes = [8, 1], strides = [1, 1]} : vector<8x256xf32> to vector<8x1xf32>
    %33 = vector.extract_strided_slice %31 {offsets = [0, 0], sizes = [8, 255], strides = [1, 1]} : vector<8x256xf32> to vector<8x255xf32>
    %34 = tpu.concatenate %32, %33 in 1 : vector<8x1xf32>, vector<8x255xf32> -> vector<8x256xf32>
    %35 = vector.extract_strided_slice %31 {offsets = [0, 1], sizes = [8, 255], strides = [1, 1]} : vector<8x256xf32> to vector<8x255xf32>
    %36 = vector.extract_strided_slice %31 {offsets = [0, 254], sizes = [8, 1], strides = [1, 1]} : vector<8x256xf32> to vector<8x1xf32>
    %37 = tpu.concatenate %35, %36 in 1 : vector<8x255xf32>, vector<8x1xf32> -> vector<8x256xf32>
    %38 = tpu.concatenate %34, %31, %37 in 0 : vector<8x256xf32>, vector<8x256xf32>, vector<8x256xf32> -> vector<24x256xf32>
    %39 = arith.truncf %38 : vector<24x256xf32> to vector<24x256xbf16>
    %c0_13 = arith.constant 0 : index
    %c0_14 = arith.constant 0 : index
    %40 = vector.load %arg6[%c0_13, %c0_14] : memref<8x24xbf16, #tpu.memory_space<vmem>>, vector<8x24xbf16>
    %cst_15 = arith.constant dense<0.000000e+00> : vector<8x256xf32>
    %41 = tpu.matmul %40, %39, %cst_15 {dimension_numbers = #tpu.dot_dimension_numbers<[1], [0], [0], [1], [0, 0, 1, 1], [], []>} : vector<8x24xbf16>, vector<24x256xbf16>, vector<8x256xf32> -> vector<8x256xf32>
    %c0_16 = arith.constant 0 : index
    %c0_17 = arith.constant 0 : index
    %42 = vector.load %arg7[%c0_16, %c0_17] : memref<8x1xf32, #tpu.memory_space<vmem>>, vector<8x1xf32>
    %43 = vector.broadcast %42 : vector<8x1xf32> to vector<8x256xf32>
    %44 = arith.addf %41, %43 : vector<8x256xf32>
    %cst_18 = arith.constant 0.000000e+00 : f32
    %45 = vector.broadcast %cst_18 : f32 to vector<8x256xf32>
    %46 = arith.maximumf %44, %45 : vector<8x256xf32>
    %47 = vector.extract_strided_slice %46 {offsets = [0, 1], sizes = [8, 1], strides = [1, 1]} : vector<8x256xf32> to vector<8x1xf32>
    %48 = vector.extract_strided_slice %46 {offsets = [0, 0], sizes = [8, 255], strides = [1, 1]} : vector<8x256xf32> to vector<8x255xf32>
    %49 = tpu.concatenate %47, %48 in 1 : vector<8x1xf32>, vector<8x255xf32> -> vector<8x256xf32>
    %50 = vector.extract_strided_slice %46 {offsets = [0, 1], sizes = [8, 255], strides = [1, 1]} : vector<8x256xf32> to vector<8x255xf32>
    %51 = vector.extract_strided_slice %46 {offsets = [0, 254], sizes = [8, 1], strides = [1, 1]} : vector<8x256xf32> to vector<8x1xf32>
    %52 = tpu.concatenate %50, %51 in 1 : vector<8x255xf32>, vector<8x1xf32> -> vector<8x256xf32>
    %53 = tpu.concatenate %49, %46, %52 in 0 : vector<8x256xf32>, vector<8x256xf32>, vector<8x256xf32> -> vector<24x256xf32>
    %54 = arith.truncf %53 : vector<24x256xf32> to vector<24x256xbf16>
    %c0_19 = arith.constant 0 : index
    %c0_20 = arith.constant 0 : index
    %55 = vector.load %arg8[%c0_19, %c0_20] : memref<8x24xbf16, #tpu.memory_space<vmem>>, vector<8x24xbf16>
    %cst_21 = arith.constant dense<0.000000e+00> : vector<8x256xf32>
    %56 = tpu.matmul %55, %54, %cst_21 {dimension_numbers = #tpu.dot_dimension_numbers<[1], [0], [0], [1], [0, 0, 1, 1], [], []>} : vector<8x24xbf16>, vector<24x256xbf16>, vector<8x256xf32> -> vector<8x256xf32>
    %c0_22 = arith.constant 0 : index
    %c0_23 = arith.constant 0 : index
    %57 = vector.load %arg9[%c0_22, %c0_23] : memref<8x1xf32, #tpu.memory_space<vmem>>, vector<8x1xf32>
    %58 = vector.broadcast %57 : vector<8x1xf32> to vector<8x256xf32>
    %59 = arith.addf %56, %58 : vector<8x256xf32>
    %c0_24 = arith.constant 0 : index
    %c0_25 = arith.constant 0 : index
    %60 = vector.load %arg10[%c0_24, %c0_25] : memref<8x1xf32, #tpu.memory_space<vmem>>, vector<8x1xf32>
    %61 = vector.broadcast %60 : vector<8x1xf32> to vector<8x256xf32>
    %62 = arith.mulf %16, %61 : vector<8x256xf32>
    %63 = arith.addf %59, %62 : vector<8x256xf32>
    %cst_26 = arith.constant 0.000000e+00 : f32
    %64 = vector.broadcast %cst_26 : f32 to vector<8x256xf32>
    %65 = arith.maximumf %63, %64 : vector<8x256xf32>
    %c0_27 = arith.constant 0 : index
    %c0_28 = arith.constant 0 : index
    %c0_29 = arith.constant 0 : index
    %66 = vector.load %arg11[%c0_27, %c0_28, %c0_29] : memref<1x8x256xf32, #tpu.memory_space<vmem>>, vector<1x8x256xf32>
    %67 = vector.shape_cast %66 : vector<1x8x256xf32> to vector<8x256xf32>
    %68 = vector.shape_cast %65 : vector<8x256xf32> to vector<1x8x256xf32>
    tpu.vector_store %arg11[%c0_27, %c0_28, %c0_29], %68 {strides = array<i32>} : memref<1x8x256xf32, #tpu.memory_space<vmem>>, vector<1x8x256xf32>,
    return
  }
  func.func @transform_0(%arg0: i32) -> (i32, i32, i32) {
    %c0_i32 = arith.constant 0 : i32
    %c0_i32_0 = arith.constant 0 : i32
    %c0_i32_1 = arith.constant 0 : i32
    return %arg0, %c0_i32, %c0_i32_0 : i32, i32, i32
  }
  func.func @transform_1(%arg0: i32) -> (i32, i32) {
    %c0_i32 = arith.constant 0 : i32
    %c0_i32_0 = arith.constant 0 : i32
    %c0_i32_1 = arith.constant 0 : i32
    return %c0_i32, %c0_i32_0 : i32, i32
  }
  func.func @transform_2(%arg0: i32) -> (i32, i32) {
    %c0_i32 = arith.constant 0 : i32
    %c0_i32_0 = arith.constant 0 : i32
    %c0_i32_1 = arith.constant 0 : i32
    return %c0_i32, %c0_i32_0 : i32, i32
  }
  func.func @transform_3(%arg0: i32) -> (i32, i32) {
    %c0_i32 = arith.constant 0 : i32
    %c0_i32_0 = arith.constant 0 : i32
    %c0_i32_1 = arith.constant 0 : i32
    return %c0_i32, %c0_i32_0 : i32, i32
  }
  func.func @transform_4(%arg0: i32) -> (i32, i32) {
    %c0_i32 = arith.constant 0 : i32
    %c0_i32_0 = arith.constant 0 : i32
    %c0_i32_1 = arith.constant 0 : i32
    return %c0_i32, %c0_i32_0 : i32, i32
  }
  func.func @transform_5(%arg0: i32) -> (i32, i32) {
    %c0_i32 = arith.constant 0 : i32
    %c0_i32_0 = arith.constant 0 : i32
    %c0_i32_1 = arith.constant 0 : i32
    return %c0_i32, %c0_i32_0 : i32, i32
  }
  func.func @transform_6(%arg0: i32) -> (i32, i32) {
    %c0_i32 = arith.constant 0 : i32
    %c0_i32_0 = arith.constant 0 : i32
    %c0_i32_1 = arith.constant 0 : i32
    return %c0_i32, %c0_i32_0 : i32, i32
  }
  func.func @transform_7(%arg0: i32) -> (i32, i32) {
    %c0_i32 = arith.constant 0 : i32
    %c0_i32_0 = arith.constant 0 : i32
    %c0_i32_1 = arith.constant 0 : i32
    return %c0_i32, %c0_i32_0 : i32, i32
  }
  func.func @transform_8(%arg0: i32) -> (i32, i32) {
    %c0_i32 = arith.constant 0 : i32
    %c0_i32_0 = arith.constant 0 : i32
    %c0_i32_1 = arith.constant 0 : i32
    return %c0_i32, %c0_i32_0 : i32, i32
  }
  func.func @transform_9(%arg0: i32) -> (i32, i32) {
    %c0_i32 = arith.constant 0 : i32
    %c0_i32_0 = arith.constant 0 : i32
    %c0_i32_1 = arith.constant 0 : i32
    return %c0_i32, %c0_i32_0 : i32, i32
  }
  func.func @transform_10(%arg0: i32) -> (i32, i32, i32) {
    %c0_i32 = arith.constant 0 : i32
    %c0_i32_0 = arith.constant 0 : i32
    %c0_i32_1 = arith.constant 0 : i32
    return %arg0, %c0_i32, %c0_i32_0 : i32, i32, i32
  }
}

</mosaic_0001>

<bundles_post_ra>
// kernel: tpu_custom_call.1
= control target key start
LH: loop header
LB: loop body
LE: loop exit
PB: predicated region body
PF: predicated region fallthrough
CT: control target
= control target key end

     0   :  { %s1170_s0 = inlined_call_operand.vmem [shape: f32[2,4,256], index: 0, kind: input, shape index: {}]   ;;  %s1171_s1 = inlined_call_operand.vmem [shape: bf16[8,12], index: 1, kind: input, shape index: {}]   ;;  %s1172_s2 = inlined_call_operand.vmem [shape: f32[8,1], index: 2, kind: input, shape index: {}]   ;;  %s1173_s3 = inlined_call_operand.vmem [shape: bf16[8,24], index: 3, kind: input, shape index: {}]   ;;  %s1174_s4 = inlined_call_operand.vmem [shape: f32[8,1], index: 4, kind: input, shape index: {}]   ;;  %s1175_s5 = inlined_call_operand.vmem [shape: bf16[8,24], index: 5, kind: input, shape index: {}]   ;;  %s1176_s6 = inlined_call_operand.vmem [shape: f32[8,1], index: 6, kind: input, shape index: {}]   ;;  %s1177_s7 = inlined_call_operand.vmem [shape: bf16[8,24], index: 7, kind: input, shape index: {}]   ;;  %s1178_s8 = inlined_call_operand.vmem [shape: f32[8,1], index: 8, kind: input, shape index: {}]   ;;  %s1179_s9 = inlined_call_operand.vmem [shape: f32[8,1], index: 9, kind: input, shape index: {}]   ;;  %s1180_s10 = inlined_call_operand.hbm [shape: f32[2,8,256], index: 10, kind: output, shape index: {}]  }
   0x1   :  { %1181 = sst [smem:[#allocation5_spill]] %s1170_s0 }
   0x2   :  { %15 = vsyncpa [#allocation3], 0 }
   0x3   :  { %17 = vsyncpa [#allocation3 + $0x1], 0  ;;  %s1000_s13 = smov 0   ;;  %s1002_s14 = smov 0  }
   0x4   :  { %s1004_s15 = smov 0   ;;  %s1006_s16 = smov 0  }
   0x5 LB: > { %s1021_s17 = sadd.s32 4294967295, %s939_s16   ;;  %s786_s18 = sadd.s32 4294967294, %s939_s16   ;;  %s939_s16 = sphi %s1006_s16, %s1188_s16   ;;  %s935_s15 = sphi %s1004_s15, %s1187_s15   ;;  %s931_s14 = sphi %s1002_s14, %s1186_s14   ;;  %s927_s13 = sphi %s1000_s13, %s1185_s13  }
   0x6   : > { %s1025_s19 = sadd.s32 1, %s939_s16   ;;  %s245_s20 = sadd.s32 1, %s935_s15 }
   0x7   : > { %s242_s21 = ssub.s32 %s939_s16, %s1025_s19  ;;  %p255_p0 = scmp.ne.s32.totalorder %s935_s15, %s931_s14 }
   0x8   : > { %p243_p1 = scmp.eq.s32.totalorder %s242_s21, 0  ;;  %p256_p2 = scmp.eq.s32.totalorder %s1021_s17, 1 }
   0x9   : > { %p261_p3 = scmp.ne.s32.totalorder %s931_s14, %s927_s13  ;;  %p262_p4 = scmp.eq.s32.totalorder %s786_s18, 1 }
   0xa   : > { %s1036_s22 = scalar_select %p243_p1, %s935_s15, %s245_s20  }
   0xb   : > { %p1038_p5 = por %p256_p2, %p255_p0  ;;  %p1042_p6 = por %p262_p4, %p261_p3 }
   0xc   : > { %p789_p7 = scmp.ge.s32.totalorder %s939_s16, 1  ;;  %p315_p8 = scmp.lt.s32.totalorder %s939_s16, 3 }
   0xe   : > { %p316_p9 = pnand %p789_p7, %p315_p8 }
   0xf   : > { %p353_p10 = scmp.lt.s32.totalorder (!%p316_p9), %s1021_s17, 1  ;;  %s1184_s0 = sld [smem:[#allocation5_spill]] (!%p316_p9) }
  0x10   : > { %319 = sbr.rel (%p316_p9) target bundleno = 1362 (0x552), region = 60  ;;  %s942_s30 = smov (!%p316_p9), 127  }
  0x11   : > { %s943_s18 = smov (!%p316_p9), 1   ;;  %s350_s28 = sand.u32 (!%p316_p9), 1, %s931_s14  }
  0x12   : > { %s807_s11 = sshll.u32 (!%p316_p9), %s1021_s17, 8  ;;  %s713_s27 = scalar_lea.sflag (!%p316_p9), [#allocation3], %s350_s28 }
  0x15   : > { %s354_s25 = scalar_select %p353_p10, %s1021_s17, 1  ;;  %v941_v3 = vmov 0   ;;  %v390_v4 = vld [vmem:[%s1172_s2] sm:$0xff]  ;;  %vm369_vm0 = vcmask 7168   ;;  %vm376_vm1 = vcmask 1039360   ;;  %vm384_vm2 = vcmask 1043456  }
  0x16   : > { %439 = vmatprep.mubr.bf16.mxu0 %v941_v3  ;;  %860 = vset.pattern.permute.xlu1 %v941_v3  ;;  %vm400_vm3 = vcmask 1045504   ;;  %v389_v21 = vld [vmem:[%s1171_s1] sm:$0xf]  ;;  %vm396_vm4 = vcmask 97280   ;;  %vm481_vm5 = vcmask 195584   ;;  %s944_s17 = smov [#allocation2]  }
  0x17   : > { %s806_s26 = sshll.u32 %s354_s25, 3  ;;  %523 = vmatprep.mubr.bf16.mxu1 %v941_v3  ;;  %866 = vset.pattern.permute.xlu0 %v941_v3  ;;  %v475_v32 = vld [vmem:[%s1174_s4] sm:$0xff] }
  0x18   : > { %s357_s29 = scalar_lea.vmem %s1184_s0, %s806_s26  ;;  %393 = vperm.xlu1 %860, %v390_v4   ;;  %v474_v47 = vld [vmem:[%s1173_s3] sm:$0xf]  ;;  %s725_s26 = scalar_lea.hbm %s1180_s10, %s807_s11 }
  0x19   : > { %v359_v0 = vld [vmem:[%s357_s29] sm:$0xff]  ;;  %s790_s29 = sshll.u32 %s350_s28, 4 }
  0x1a   : > { %v364_v1 = vcombine.high %v359_v0, %v359_v0  ;;  %v382_v9 = vcombine.low %v359_v0, %v359_v0  ;;  %v559_v58 = vld [vmem:[%s1176_s6] sm:$0xff]  ;;  %s352_s12 = scalar_lea.vmem [#allocation2], %s790_s29 }
  0x1b   : > { %s727_s20 = sshll.u32 %s352_s12, 4  ;;  %s728_s20 = int_to_ptr.vmem [resolvable:$true] %s727_s20 }
  0x1c   : > { %v850_v2 = vpack.i.bf16 %v364_v1, %v359_v0 }
  0x1e   : > { %851 = vrot.lane.b32.xlu0 %v850_v2, %s942_s30 }
  0x22   : > { %856 = vrot.lane.b32.xlu0 %v850_v2, %s943_s18 }
  0x90   : > { %v852_v5 = vpop.permute.xlu0 %851 }
  0x91   : > { %v854_v6 = vunpack.i.h.bf16 %v852_v5  ;;  %v853_v7 = vunpack.i.l.bf16 %v852_v5 }
  0x93   : > { %v377_v16 = vsel %vm376_vm1, %v853_v7, %v854_v6  ;;  %v394_v22 = vpop.permute.xlu1 %393 }
  0x94   : > { %v857_v8 = vpop.permute.xlu0 %856 }
  0x95   : > { %v859_v10 = vunpack.i.h.bf16 %v857_v8  ;;  %v858_v11 = vunpack.i.l.bf16 %v857_v8 }
  0x97   : > { %v370_v12 = vsel %vm369_vm0, %v858_v11, %v859_v10  ;;  %v381_v13 = vsel %vm376_vm1, %v854_v6, %v859_v10  ;;  %v373_v14 = vsel %vm369_vm0, %v853_v7, %v858_v11 }
  0x98   : > { %v386_v15 = vsel %vm384_vm2, %v370_v12, %v359_v0  ;;  %v385_v17 = vsel %vm384_vm2, %v373_v14, %v382_v9  ;;  %v558_v9 = vld [vmem:[%s1175_s5] sm:$0xf] }
  0x99   : > { %v388_v18 = vpack.c.bf16 %v381_v13, %v386_v15  ;;  %v387_v19 = vpack.c.bf16 %v377_v16, %v385_v17 }
  0x9b   : > { %793 = vmatprep.subr.msk.bf16.mxu0 %vm400_vm3, %v388_v18  ;;  %v402_v20 = vsel %vm400_vm3, %v387_v19, 0 }
  0x9c   : > { %422 = vmatpush1.bf16.msra.mxu0 %v402_v20  ;;  %v642_v20 = vld [vmem:[%s1178_s8] sm:$0xff] }
  0x9f   : > { %794 = vmatmul.mubr.msk.bf16.vlgmr.msra.gmra.mxu0 %vm396_vm4, %v389_v21  ;;  %v698_v21 = vld [vmem:[%s1179_s9] sm:$0xff] }
  0xa0   : > { %606 = vmatprep.mubr.bf16.mxu0 %v941_v3 }
 0x15f   : > { %v441_v23 = vpop.f32.mrf.mxu0 }
 0x160   : > { %v442_v24 = vadd.f32 %v441_v23, %v394_v22 }
 0x161   : > { %v443_v25 = vpop.f32.mrf.mxu0 }
 0x162   : > { %v444_v26 = vadd.f32 %v443_v25, %v394_v22  ;;  %v1072_v28 = vmax.f32 %v442_v24, 0.0 }
 0x163   : > { %v445_v27 = vpop.f32.mrf.mxu0 }
 0x164   : > { %v1074_v29 = vmax.f32 %v444_v26, 0.0 }
 0x165   : > { %v446_v30 = vpop.f32.mrf.mxu0 }
 0x166   : > { %457 = vrot.lane.b32.xlu0 %v1074_v29, %s943_s18  ;;  %v861_v31 = vpack.i.bf16 %v1074_v29, %v1072_v28 }
 0x168   : > { %862 = vrot.lane.b32.xlu1 %v861_v31, %s942_s30 }
 0x16a   : > { %478 = vperm.xlu0 %866, %v475_v32  }
 0x16c   : > { %455 = vrot.lane.b32.xlu1 %v1072_v28, %s943_s18 }
 0x1d8   : > { %v458_v36 = vpop.permute.xlu0 %457 }
 0x1da   : > { %v863_v33 = vpop.permute.xlu1 %862 }
 0x1db   : > { %v865_v34 = vunpack.i.h.bf16 %v863_v33  ;;  %v864_v35 = vunpack.i.l.bf16 %v863_v33 }
 0x1dd   : > { %v469_v37 = vsel %vm376_vm1, %v865_v34, %v458_v36  ;;  %v465_v38 = vsel %vm376_vm1, %v864_v35, %v865_v34 }
 0x1de   : > { %v456_v39 = vpop.permute.xlu1 %455  ;;  %v473_v40 = vpack.c.bf16 %v469_v37, %v469_v37  ;;  %v472_v41 = vpack.c.bf16 %v465_v38, %v465_v38  ;;  %v641_v38 = vld [vmem:[%s1177_s7] sm:$0xf] }
 0x1df   : > { %v459_v42 = vsel %vm369_vm0, %v456_v39, %v458_v36  ;;  %v462_v43 = vsel %vm369_vm0, %v864_v35, %v456_v39 }
 0x1e0   : > { %v471_v44 = vpack.c.bf16 %v1074_v29, %v459_v42  ;;  %795 = vmatprep.subr.msk.bf16.mxu1 %vm384_vm2, %v473_v40  ;;  %v486_v45 = vsel %vm384_vm2, %v472_v41, 0  ;;  %v470_v46 = vpack.c.bf16 %v1072_v28, %v462_v43 }
 0x1e1   : > { %504 = vmatpush1.bf16.msra.mxu1 %v486_v45 }
 0x1e2   : > { %505 = vmatprep.subr.bf16.mxu1 %v471_v44 }
 0x1e5   : > { %506 = vmatpush1.bf16.msra.mxu1 %v470_v46  ;;  %v479_v48 = vpop.permute.xlu0 %478 }
 0x1e8   : > { %796 = vmatmul.mubr.msk.bf16.vlgmr.msra.gmra.mxu1 %vm481_vm5, %v474_v47 }
 0x1e9   : > { %689 = vmatprep.mubr.bf16.mxu1 %v941_v3 }
 0x2a8   : > { %v525_v49 = vpop.f32.mrf.mxu1 }
 0x2a9   : > { %v526_v50 = vadd.f32 %v525_v49, %v479_v48 }
 0x2aa   : > { %v527_v51 = vpop.f32.mrf.mxu1 }
 0x2ab   : > { %v532_v52 = vmax.f32 %v526_v50, 0.0  ;;  %v528_v53 = vadd.f32 %v527_v51, %v479_v48 }
 0x2ac   : > { %v529_v54 = vpop.f32.mrf.mxu1 }
 0x2ad   : > { %v533_v55 = vmax.f32 %v528_v53, 0.0  ;;  %539 = vrot.lane.b32.xlu0 %v532_v52, %s943_s18 }
 0x2ae   : > { %v530_v56 = vpop.f32.mrf.mxu1 }
 0x2af   : > { %v867_v57 = vpack.i.bf16 %v533_v55, %v532_v52 }
 0x2b1   : > { %868 = vrot.lane.b32.xlu1 %v867_v57, %s942_s30 }
 0x2b5   : > { %541 = vrot.lane.b32.xlu1 %v533_v55, %s943_s18 }
 0x2b9   : > { %562 = vperm.xlu1 %860, %v559_v58  }
 0x31f   : > { %v540_v63 = vpop.permute.xlu0 %539 }
 0x323   : > { %v869_v59 = vpop.permute.xlu1 %868 }
 0x324   : > { %v871_v60 = vunpack.i.h.bf16 %v869_v59  ;;  %v870_v61 = vunpack.i.l.bf16 %v869_v59 }
 0x326   : > { %v549_v62 = vsel %vm376_vm1, %v870_v61, %v871_v60  ;;  %v546_v5 = vsel %vm369_vm0, %v870_v61, %v540_v63 }
 0x327   : > { %v542_v0 = vpop.permute.xlu1 %541  ;;  %v556_v1 = vpack.c.bf16 %v549_v62, %v549_v62  ;;  %v554_v8 = vpack.c.bf16 %v532_v52, %v546_v5 }
 0x328   : > { %v543_v2 = vsel %vm369_vm0, %v540_v63, %v542_v0  ;;  %v553_v3 = vsel %vm376_vm1, %v871_v60, %v542_v0 }
 0x329   : > { %v557_v4 = vpack.c.bf16 %v553_v3, %v553_v3  ;;  %v555_v6 = vpack.c.bf16 %v533_v55, %v543_v2  ;;  %v569_v7 = vsel %vm384_vm2, %v556_v1, 0 }
 0x32b   : > { %797 = vmatprep.subr.msk.bf16.mxu0 %vm384_vm2, %v557_v4 }
 0x32c   : > { %587 = vmatpush1.bf16.msra.mxu0 %v569_v7 }
 0x32d   : > { %588 = vmatprep.subr.bf16.mxu0 %v555_v6 }
 0x330   : > { %589 = vmatpush1.bf16.msra.mxu0 %v554_v8 }
 0x333   : > { %798 = vmatmul.mubr.msk.bf16.vlgmr.msra.gmra.mxu0 %vm481_vm5, %v558_v9 }
 0x334   : > { %v563_v10 = vpop.permute.xlu1 %562 }
 0x3f3   : > { %v608_v11 = vpop.f32.mrf.mxu0 }
 0x3f4   : > { %v609_v12 = vadd.f32 %v608_v11, %v563_v10 }
 0x3f5   : > { %v610_v13 = vpop.f32.mrf.mxu0 }
 0x3f6   : > { %v611_v14 = vadd.f32 %v610_v13, %v563_v10  ;;  %v615_v16 = vmax.f32 %v609_v12, 0.0 }
 0x3f7   : > { %v612_v15 = vpop.f32.mrf.mxu0 }
 0x3f8   : > { %v616_v17 = vmax.f32 %v611_v14, 0.0 }
 0x3f9   : > { %v613_v18 = vpop.f32.mrf.mxu0 }
 0x3fa   : > { %624 = vrot.lane.b32.xlu1 %v616_v17, %s943_s18  ;;  %v872_v19 = vpack.i.bf16 %v616_v17, %v615_v16 }
 0x3fc   : > { %873 = vrot.lane.b32.xlu0 %v872_v19, %s942_s30  ;;  %s879_s30 = scalar_lea.vmem %s728_s20, 256 }
 0x3fd   : > { %p880_p11 = scmp.ne.s32.totalorder %s728_s20, %s879_s30 }
 0x3fe   : > { %645 = vperm.xlu1 %860, %v642_v20  }
 0x3ff   : > { %p881_p12 = pnand %p880_p11, %p1038_p5 }
 0x400   : > { %622 = vrot.lane.b32.xlu0 %v615_v16, %s943_s18  ;;  %s883_s18 = sshll.u32 %s944_s17, 4  ;;  %s884_s18 = int_to_ptr.vmem [resolvable:$false] %s883_s18 }
 0x401   : > { %p882_p13 = pneg %p881_p12  ;;  %s885_s29 = scalar_lea.vmem %s884_s18, 512 }
 0x402   : > { %p886_p0 = scmp.lt.s32.totalorder %s728_s20, %s884_s18  ;;  %p887_p1 = scmp.lt.s32.totalorder %s885_s29, %s879_s30 }
 0x404   : > { %701 = vperm.xlu0 %866, %v698_v21   ;;  %p888_p2 = por %p887_p1, %p886_p0 }
 0x406   : > { %p889_p3 = pnand %p888_p2, %p882_p13 }
 0x46c   : > { %v625_v25 = vpop.permute.xlu1 %624 }
 0x46e   : > { %v874_v22 = vpop.permute.xlu0 %873 }
 0x46f   : > { %v876_v23 = vunpack.i.h.bf16 %v874_v22  ;;  %v875_v24 = vunpack.i.l.bf16 %v874_v22 }
 0x471   : > { %v636_v26 = vsel %vm376_vm1, %v876_v23, %v625_v25  ;;  %v632_v27 = vsel %vm376_vm1, %v875_v24, %v876_v23 }
 0x472   : > { %v640_v30 = vpack.c.bf16 %v636_v26, %v636_v26  ;;  %v623_v31 = vpop.permute.xlu0 %622  ;;  %v639_v32 = vpack.c.bf16 %v632_v27, %v632_v27 }
 0x473   : > { %v626_v33 = vsel %vm369_vm0, %v623_v31, %v625_v25  ;;  %v629_v34 = vsel %vm369_vm0, %v875_v24, %v623_v31 }
 0x474   : > { %v638_v35 = vpack.c.bf16 %v616_v17, %v626_v33  ;;  %799 = vmatprep.subr.msk.bf16.mxu1 %vm384_vm2, %v640_v30  ;;  %v652_v36 = vsel %vm384_vm2, %v639_v32, 0  ;;  %v637_v37 = vpack.c.bf16 %v615_v16, %v629_v34 }
 0x475   : > { %670 = vmatpush1.bf16.msra.mxu1 %v652_v36 }
 0x476   : > { %671 = vmatprep.subr.bf16.mxu1 %v638_v35 }
 0x479   : > { %672 = vmatpush1.bf16.msra.mxu1 %v637_v37  ;;  %v646_v40 = vpop.permute.xlu1 %645 }
 0x47c   : > { %800 = vmatmul.mubr.msk.bf16.vlgmr.msra.gmra.mxu1 %vm481_vm5, %v641_v38 }
 0x47f   : > { %v702_v39 = vpop.permute.xlu0 %701 }
 0x480   : > { %v704_v42 = vmul.f32 %v702_v39, %v1072_v28  ;;  %v705_v45 = vmul.f32 %v702_v39, %v1074_v29 }
 0x53c   : > { %v691_v41 = vpop.f32.mrf.mxu1 }
 0x53d   : > { %v692_v43 = vadd.f32 %v691_v41, %v646_v40 }
 0x53e   : > { %v693_v44 = vpop.f32.mrf.mxu1 }
 0x53f   : > { %v706_v46 = vadd.f32 %v704_v42, %v692_v43  ;;  %v694_v47 = vadd.f32 %v693_v44, %v646_v40 }
 0x540   : > { %v695_v48 = vpop.f32.mrf.mxu1 }
 0x541   : > { %v708_v49 = vmax.f32 %v706_v46, 0.0  ;;  %v707_v50 = vadd.f32 %v705_v45, %v694_v47 }
 0x542   : > { %v696_v51 = vpop.f32.mrf.mxu1 }
 0x543   : > { %710 = vst [vmem:[%s352_s12] sm:$0xff] %v708_v49  ;;  %v709_v52 = vmax.f32 %v707_v50, 0.0 }
 0x545   : > { %711 = vst [vmem:[%s352_s12 + $0x8] sm:$0xff] %v709_v52 }
 0x546   : > { %892 = shalt.err (!%p889_p3)
}
 0x547   : > { %s893_s0 = scalar_lea.hbm %s725_s26, 256  ;;  %s897_s12 = scalar_lea.hbm %s1180_s10, 512 }
 0x548   : > { %p894_p4 = scmp.ne.s32.totalorder %s725_s26, %s893_s0  ;;  %p898_p9 = scmp.lt.s32.totalorder %s725_s26, %s1180_s10 }
 0x549   : > { %p899_p10 = scmp.lt.s32.totalorder %s897_s12, %s893_s0 }
 0x54a   : > { %p895_p7 = pnand %p894_p4, %p1038_p5 }
 0x54b   : > { %p900_p11 = por %p899_p10, %p898_p9 }
 0x54c   : > { %p896_p8 = pneg %p895_p7 }
 0x54e   : > { %p901_p12 = pnand %p900_p11, %p896_p8 }
 0x550   : > { %904 = shalt.err (!%p901_p12)
}
 0x551   : > { %808 = dma.vmem_to_hbm [thread:$0]  (%p1038_p5), %s728_s20, 256, %s725_s26, %s713_s27  }
 0x552 PF: > { %p814_p13 = scmp.ge.s32.totalorder %s939_s16, 2  ;;  %s739_s30 = sand.u32 1, %s927_s13  }
 0x553   : > { %s740_s17 = scalar_lea.sflag [#allocation3], %s739_s30 }
 0x554   : > { %p811_p0 = pnand %p814_p13, %p1042_p6 }
 0x556   : > { %p812_p1 = pneg %p811_p0 }
 0x558   : > { %922 = dma.done.wait (%p812_p1), %s740_s17, 256  }
 0x559   : > { %924 = vsyncadd (%p812_p1), %s740_s17, 4294967040  ;;  %p20_p2 = scmp.ge.s32.totalorder %s1025_s19, 4   ;;  %s1185_s13 = smov %s931_s14 }
 0x55a   : > { %s1186_s14 = smov %s935_s15  ;;  %s1187_s15 = smov %s1036_s22 }
 0x55b   : > { %s1188_s16 = smov %s1025_s19  ;;  %22 = sbr.rel (!%p20_p2) target bundleno = 5 (0x5), region = 95 }
 0x560   :  { %745 = vsyncpa [#allocation3], 1 }
 0x561   :  { %747 = vsyncpa [#allocation3 + $0x1], 1 }

</bundles_post_ra>
